<compile_context>
chip_gen: v7x
topology: tpu7x:2x2x1
jax: 0.10.0
libtpu: 0.0.40
codegen_flags: <defaults>
</compile_context>

<pallas_src>
import jax
import jax.numpy as jnp
from jax.experimental import pallas as pl
from jax.experimental.pallas import tpu as pltpu

_MiB = 1024 * 1024


def _round_up(a, b):
    return (a + b - 1) // b * b


def _sublane(dtype):
    # Sub-32-bit dtypes pack 16/32 rows per sublane group.
    return {4: 8, 2: 16, 1: 32}.get(jnp.dtype(dtype).itemsize, 8)


def _vmem_capacity_bytes():
    try:
        info = pltpu.get_tpu_info()
        cap = int(getattr(info, "vmem_capacity_bytes", 0))
        if cap > 0:
            return cap
    except Exception:
        pass
    return 64 * _MiB  # conservative (v7x-sized) default


# --------------------------------------------------------------------------
# Kernels
# --------------------------------------------------------------------------
def _fullk_kernel(x_ref, w_ref, o_ref):
    # out_tile = x_tile (tm, K) @ w_tile (K, tn); W is already stored (K, N).
    o_ref[...] = jnp.dot(
        x_ref[...], w_ref[...], preferred_element_type=jnp.float32
    ).astype(o_ref.dtype)


def _ktiled_f32_kernel(x_ref, w_ref, o_ref):
    # f32 output: accumulate directly into the resident output block.
    @pl.when(pl.program_id(2) == 0)
    def _():
        o_ref[...] = jnp.zeros_like(o_ref)

    o_ref[...] += jnp.dot(
        x_ref[...], w_ref[...], preferred_element_type=jnp.float32
    )


def _ktiled_acc_kernel(x_ref, w_ref, o_ref, acc_ref):
    # Lower-precision output: keep an f32 scratch accumulator.
    @pl.when(pl.program_id(2) == 0)
    def _():
        acc_ref[...] = jnp.zeros_like(acc_ref)

    acc_ref[...] += jnp.dot(
        x_ref[...], w_ref[...], preferred_element_type=jnp.float32
    )

    @pl.when(pl.program_id(2) == pl.num_programs(2) - 1)
    def _():
        o_ref[...] = acc_ref[...].astype(o_ref.dtype)


# --------------------------------------------------------------------------
# Wrapper: out[:, :n_valid] = x @ w_kn[:, :n_valid]
# w_kn is the pre-transposed (K, Np) weight, Np a multiple of 128.
# --------------------------------------------------------------------------
def _matmul_x_wkn(x, w_kn, n_valid, out_dtype):
    B, K = x.shape
    Kw, Np = w_kn.shape
    assert K == Kw, "input_size mismatch"
    isz = jnp.dtype(x.dtype).itemsize
    osz = jnp.dtype(out_dtype).itemsize
    sub = _sublane(x.dtype)
    cap = _vmem_capacity_bytes()

    def _trim(o, Bp):
        if Bp == B and Np == n_valid:
            return o
        return o[:B, :n_valid]

    # ---- single-block fast path (the module's realistic head shapes) ----
    if cap >= 100 * _MiB:      # v5e / v6e: 128 MiB physical VMEM
        sb_threshold = 24 * _MiB
    elif cap >= 48 * _MiB:     # v7x: 64 MiB physical VMEM
        sb_threshold = 20 * _MiB
    else:
        sb_threshold = 12 * _MiB
    total_bytes = (B * K + K * Np) * isz + B * Np * osz
    if total_bytes <= sb_threshold:
        out = pl.pallas_call(
            _fullk_kernel,
            out_shape=jax.ShapeDtypeStruct((B, Np), out_dtype),
            in_specs=[
                pl.BlockSpec(memory_space=pltpu.MemorySpace.VMEM),
                pl.BlockSpec(memory_space=pltpu.MemorySpace.VMEM),
            ],
            out_specs=pl.BlockSpec(memory_space=pltpu.MemorySpace.VMEM),
            compiler_params=pltpu.CompilerParams(
                vmem_limit_bytes=int(min(0.9 * cap, total_bytes + 8 * _MiB)),
            ),
        )(x, w_kn)
        return _trim(out, B)

    # ---- full-K tiled path: resident x row-block, streaming W strips ----
    usable = min(int(cap * 0.7), 96 * _MiB)
    reserve = 2 * _MiB

    tn = None
    for cand in (512, 384, 256, 128):
        if Np % cand == 0 and 2 * K * cand * isz <= usable // 2:
            tn = cand
            break

    if tn is not None:
        # x is single-buffered (its block index changes at most once per full
        # N sweep); the W strip and output tile are double-buffered.
        per_row = K * isz + 2 * tn * osz
        tm_budget = (usable - 2 * K * tn * isz - reserve) // per_row
        if tm_budget >= sub:
            if tm_budget >= B:
                tm, grid_m, Bp = B, 1, B   # W streams from HBM exactly once
                xp = x
            else:
                tm0 = max(sub, (tm_budget // sub) * sub)
                grid_m = -(-B // tm0)
                tm = _round_up(-(-B // grid_m), sub)
                Bp = grid_m * tm
                # Only ragged, very-large-B shapes pay a small per-call x pad.
                xp = jnp.pad(x, ((0, Bp - B), (0, 0))) if Bp != B else x

            grid_n = Np // tn
            if grid_m == 1 and grid_n == 1 and Np >= 256:
                # Make sure both v7x TensorCores get a parallel block.
                tn = 128
                grid_n = Np // tn

            est = tm * K * isz + 2 * K * tn * isz + 2 * tm * tn * osz
            out = pl.pallas_call(
                _fullk_kernel,
                out_shape=jax.ShapeDtypeStruct((Bp, Np), out_dtype),
                grid_spec=pltpu.PrefetchScalarGridSpec(
                    num_scalar_prefetch=0,
                    grid=(grid_m, grid_n),
                    in_specs=[
                        pl.BlockSpec((tm, K), lambda i, j: (i, 0),
                                     pipeline_mode=pl.Buffered(1)),
                        pl.BlockSpec((K, tn), lambda i, j: (0, j)),
                    ],
                    out_specs=pl.BlockSpec((tm, tn), lambda i, j: (i, j)),
                ),
                compiler_params=pltpu.CompilerParams(
                    dimension_semantics=("parallel", "parallel"),
                    vmem_limit_bytes=int(min(0.9 * cap, est + 8 * _MiB)),
                ),
            )(xp, w_kn)
            return _trim(out, Bp)

    # ---- K-tiled fallback (K too large for full-K strips in VMEM) ----
    tm = min(_round_up(B, sub), 256)
    tn = 256 if Np % 256 == 0 else 128
    tk = 512
    Bp = _round_up(B, tm)
    Kp = _round_up(K, tk)
    # TODO(synk): this rare path pays a per-call zero-pad over K; it is hit
    # only when even a 128-lane full-K weight strip exceeds the VMEM budget.
    xp = jnp.pad(x, ((0, Bp - B), (0, Kp - K))) if (Bp != B or Kp != K) else x
    wp = jnp.pad(w_kn, ((0, Kp - K), (0, 0))) if Kp != K else w_kn

    if jnp.dtype(out_dtype) == jnp.dtype(jnp.float32):
        kernel, scratch = _ktiled_f32_kernel, []
    else:
        kernel, scratch = _ktiled_acc_kernel, [pltpu.VMEM((tm, tn), jnp.float32)]

    est = 2 * (tm * tk + tk * tn) * isz + 2 * tm * tn * osz + tm * tn * 4
    out = pl.pallas_call(
        kernel,
        out_shape=jax.ShapeDtypeStruct((Bp, Np), out_dtype),
        grid_spec=pltpu.PrefetchScalarGridSpec(
            num_scalar_prefetch=0,
            grid=(Bp // tm, Np // tn, Kp // tk),
            in_specs=[
                pl.BlockSpec((tm, tk), lambda i, j, k: (i, k)),
                pl.BlockSpec((tk, tn), lambda i, j, k: (k, j)),
            ],
            out_specs=pl.BlockSpec((tm, tn), lambda i, j, k: (i, j)),
            scratch_shapes=scratch,
        ),
        compiler_params=pltpu.CompilerParams(
            dimension_semantics=("parallel", "parallel", "arbitrary"),
            vmem_limit_bytes=int(min(0.9 * cap, est + 8 * _MiB)),
        ),
    )(xp, wp)
    return _trim(out, Bp)


# --------------------------------------------------------------------------
# Public API
# --------------------------------------------------------------------------
def make_prediction_layer(weight, *, out_dtype=None):
    """Build the PredictionLayer forward: f(x) = x @ weight.T (no bias).

    `weight` is the PyTorch nn.Linear parameter, shape (num_classes, input_size).
    It is transposed to (input_size, num_classes) and lane-padded ONCE here
    (it is a static parameter), so the per-call hot path does no layout work.
    """
    N, K = weight.shape
    Np = _round_up(N, 128)
    w_kn = jnp.transpose(weight)                      # (K, N): MXU-native feed
    if Np != N:
        w_kn = jnp.pad(w_kn, ((0, 0), (0, Np - N)))   # lane-dense output tiles
    w_kn = jax.device_put(w_kn)

    def apply(x):
        od = x.dtype if out_dtype is None else out_dtype
        return _matmul_x_wkn(x, w_kn, N, od)

    return jax.jit(apply)


def prediction_layer(x, weight):
    """One-shot convenience (weight prep runs per call; prefer make_prediction_layer)."""
    return make_prediction_layer(weight)(x)


if __name__ == "__main__":
    key = jax.random.PRNGKey(0)
    kx, kw, kx2, kw2 = jax.random.split(key, 4)

    # ---- 1) module-realistic small shapes (grid-free single-block path) ----
    B, INPUT_SIZE, NUM_CLASSES = 8, 256, 128
    x = jax.random.normal(kx, (B, INPUT_SIZE), dtype=jnp.float32)
    bound = 1.0 / float(INPUT_SIZE) ** 0.5
    weight = jax.random.uniform(
        kw, (NUM_CLASSES, INPUT_SIZE), minval=-bound, maxval=bound, dtype=jnp.float32
    )

    layer = make_prediction_layer(weight)      # one-time weight transpose/pad
    out = jax.block_until_ready(layer(x))
    ref = jnp.dot(x, weight.T, precision=jax.lax.Precision.HIGHEST)
    assert out.shape == (B, NUM_CLASSES)
    assert jnp.allclose(out, ref, atol=1e-4, rtol=1e-4)

    # ---- 2) larger, ragged shapes: tiled resident-x / streaming-W path ----
    B2, K2, N2 = 1024, 4096, 1000              # N2 not a multiple of 128 on purpose
    x2 = jax.random.normal(kx2, (B2, K2), dtype=jnp.float32)
    bound2 = 1.0 / float(K2) ** 0.5
    w2 = jax.random.uniform(
        kw2, (N2, K2), minval=-bound2, maxval=bound2, dtype=jnp.float32
    )

    layer2 = make_prediction_layer(w2)
    out2 = jax.block_until_ready(layer2(x2))
    ref2 = jnp.dot(x2, w2.T, precision=jax.lax.Precision.HIGHEST)
    assert out2.shape == (B2, N2)
    assert jnp.allclose(out2, ref2, atol=5e-3, rtol=5e-3)

    print("KERNEL_OK")
</pallas_src>

<mosaic_0001>
module attributes {stable_mosaic.version = 11 : i64} {
  func.func @_fullk_kernel(%arg0: memref<8x256xf32, #tpu.memory_space<vmem>>, %arg1: memref<256x128xf32, #tpu.memory_space<vmem>>, %arg2: memref<8x128xf32, #tpu.memory_space<vmem>>) attributes {dimension_semantics = [], scalar_prefetch = 0 : i64, scratch_operands = 0 : i64, tpu.core_type = #tpu.core_type<tc>} {
    %c0 = arith.constant 0 : index
    %c0_0 = arith.constant 0 : index
    %0 = vector.load %arg0[%c0, %c0_0] : memref<8x256xf32, #tpu.memory_space<vmem>>, vector<8x256xf32>
    %c0_1 = arith.constant 0 : index
    %c0_2 = arith.constant 0 : index
    %1 = vector.load %arg1[%c0_1, %c0_2] : memref<256x128xf32, #tpu.memory_space<vmem>>, vector<256x128xf32>
    %cst = arith.constant dense<0.000000e+00> : vector<8x128xf32>
    %2 = tpu.matmul %0, %1, %cst {dimension_numbers = #tpu.dot_dimension_numbers<[1], [0], [0], [1], [0, 0, 1, 1], [], []>} : vector<8x256xf32>, vector<256x128xf32>, vector<8x128xf32> -> vector<8x128xf32>
    %c0_3 = arith.constant 0 : index
    %c0_4 = arith.constant 0 : index
    %3 = vector.load %arg2[%c0_3, %c0_4] : memref<8x128xf32, #tpu.memory_space<vmem>>, vector<8x128xf32>
    tpu.vector_store %arg2[%c0_3, %c0_4], %2 {strides = array<i32>} : memref<8x128xf32, #tpu.memory_space<vmem>>, vector<8x128xf32>,
    return
  }
}

</mosaic_0001>

<bundles_post_ra>
// kernel: apply.1
= control target key start
LH: loop header
LB: loop body
LE: loop exit
PB: predicated region body
PF: predicated region fallthrough
CT: control target
= control target key end

     0   :  { %7 = vsyncpa [#allocation3], 0  ;;  %s366_s0 = inlined_call_operand.hbm [shape: f32[8,256], index: 0, kind: input, shape index: {}]   ;;  %s367_s1 = inlined_call_operand.hbm [shape: f32[256,128], index: 1, kind: input, shape index: {}]   ;;  %s368_s2 = inlined_call_operand.hbm [shape: f32[8,128], index: 2, kind: output, shape index: {}]  }
   0x1   :  { %8 = vsyncpa [#allocation6], 0 }
   0x2   :  { %9 = vsyncpa [#allocation4], 0  ;;  %s303_s9 = smov [#allocation2]   ;;  %s304_s11 = smov [#allocation5]  }
   0x3   :  { %s16_s10 = sshll.u32 %s303_s9, 4  ;;  %s25_s12 = sshll.u32 %s304_s11, 4  ;;  %s17_s10 = int_to_ptr.vmem [resolvable:$true] %s16_s10  ;;  %s323_s12 = int_to_ptr.vmem [resolvable:$true] %s25_s12 }
   0x4   :  { %s231_s15 = scalar_lea.hbm %s366_s0, 256 }
   0x5   :  { %p232_p0 = scmp.ne.s32.totalorder %s366_s0, %s231_s15  ;;  %p235_p1 = scmp.lt.u32.totalorder %s231_s15, %s366_s0 }
   0x7   :  { %p237_p2 = pnand %p235_p1, %p232_p0 }
   0x9   :  { %240 = shalt.err (!%p237_p2)
}
   0xa   :  { %s241_s20 = scalar_lea.vmem %s17_s10, 256  ;;  %p246_p4 = scmp.lt.s32.totalorder %s17_s10, %s17_s10 }
   0xb   :  { %p242_p3 = scmp.ne.s32.totalorder %s17_s10, %s241_s20  ;;  %p247_p5 = scmp.lt.s32.totalorder %s241_s20, %s241_s20 }
   0xd   :  { %p248_p6 = por %p247_p5, %p246_p4 }
   0xf   :  { %p249_p7 = pnand %p248_p6, %p242_p3 }
  0x11   :  { %252 = shalt.err (!%p249_p7)
}
  0x12   :  { %19 = dma.hbm_to_vmem [thread:$0]  %s366_s0, 256, %s17_s10, [#allocation3]  }
  0x13   :  { %s253_s25 = scalar_lea.hbm %s367_s1, 4096 }
  0x14   :  { %p254_p8 = scmp.ne.s32.totalorder %s367_s1, %s253_s25  ;;  %p257_p9 = scmp.lt.u32.totalorder %s253_s25, %s367_s1 }
  0x16   :  { %p259_p10 = pnand %p257_p9, %p254_p8 }
  0x18   :  { %262 = shalt.err (!%p259_p10)
}
  0x19   :  { %s263_s30 = scalar_lea.vmem %s323_s12, 4096  ;;  %p268_p12 = scmp.lt.s32.totalorder %s323_s12, %s323_s12 }
  0x1a   :  { %p264_p11 = scmp.ne.s32.totalorder %s323_s12, %s263_s30  ;;  %p269_p13 = scmp.lt.s32.totalorder %s263_s30, %s263_s30 }
  0x1c   :  { %p270_p0 = por %p269_p13, %p268_p12 }
  0x1e   :  { %p271_p1 = pnand %p270_p0, %p264_p11 }
  0x20   :  { %274 = shalt.err (!%p271_p1)
}
  0x21   :  { %s305_s0 = smov 128   ;;  %s306_s3 = smov 8  }
  0x22   :  { %31 = dma.hbm_to_vmem [thread:$0]  %s367_s1, 4096, %s323_s12, [#allocation6], %s305_s0, %s305_s0, %s306_s3  }
  0x23   :  { %297 = dma.done.wait [#allocation3], 256  }
  0x24   :  { %298 = vsyncadd [#allocation3], 4294967040 }
  0x25   :  { %299 = dma.done.wait [#allocation6], 4096  }
  0x26   :  { %300 = vsyncadd [#allocation6], 4294963200  ;;  %v56_v0 = vld [vmem:[#allocation5 + $0x80] sm:$0xff]  ;;  %v57_v1 = vld [vmem:[#allocation5 + $0x88] sm:$0xff]  ;;  %s307_s1 = smov [#allocation7]  }
  0x27   :  { %v40_v2 = vld [vmem:[#allocation5] sm:$0xff]  ;;  %v194_v3 = vpack.c.bf16 %v57_v1, %v56_v0  ;;  %v41_v4 = vld [vmem:[#allocation5 + $0x8] sm:$0xff]  ;;  %v58_v5 = vld [vmem:[#allocation5 + $0x90] sm:$0xff]  ;;  %s149_s6 = sshll.u32 %s307_s1, 4  ;;  %s150_s6 = int_to_ptr.vmem [resolvable:$true] %s149_s6 }
  0x28   :  { %v59_v6 = vld [vmem:[#allocation5 + $0x98] sm:$0xff]  ;;  %v196_v7 = vpack.c.bf16 %v41_v4, %v40_v2  ;;  %v42_v9 = vld [vmem:[#allocation5 + $0x10] sm:$0xff]  ;;  %v60_v11 = vld [vmem:[#allocation5 + $0xa0] sm:$0xff]  ;;  %s275_s7 = scalar_lea.vmem %s150_s6, 128  ;;  %p280_p3 = scmp.lt.s32.totalorder %s150_s6, %s150_s6 }
  0x29   :  { %v198_v8 = vpack.c.bf16 %v59_v6, %v58_v5  ;;  %v43_v10 = vld [vmem:[#allocation5 + $0x18] sm:$0xff]  ;;  %195 = vmatprep.subr.bf16.mxu0 %v194_v3  ;;  %v61_v12 = vld [vmem:[#allocation5 + $0xa8] sm:$0xff]  ;;  %v44_v15 = vld [vmem:[#allocation5 + $0x20] sm:$0xff]  ;;  %p276_p2 = scmp.ne.s32.totalorder %s150_s6, %s275_s7  ;;  %p281_p4 = scmp.lt.s32.totalorder %s275_s7, %s275_s7 }
  0x2a   :  { %197 = vmatpush3.bf16.msra.mxu0 %v196_v7  ;;  %v200_v13 = vpack.c.bf16 %v43_v10, %v42_v9  ;;  %v202_v14 = vpack.c.bf16 %v61_v12, %v60_v11  ;;  %v45_v16 = vld [vmem:[#allocation5 + $0x28] sm:$0xff]  ;;  %v62_v17 = vld [vmem:[#allocation5 + $0xb0] sm:$0xff]  ;;  %v63_v18 = vld [vmem:[#allocation5 + $0xb8] sm:$0xff] }
  0x2b   :  { %199 = vmatprep.subr.bf16.mxu0 %v198_v8  ;;  %v204_v19 = vpack.c.bf16 %v45_v16, %v44_v15  ;;  %v206_v20 = vpack.c.bf16 %v63_v18, %v62_v17  ;;  %v46_v21 = vld [vmem:[#allocation5 + $0x30] sm:$0xff]  ;;  %v47_v22 = vld [vmem:[#allocation5 + $0x38] sm:$0xff]  ;;  %v64_v23 = vld [vmem:[#allocation5 + $0xc0] sm:$0xff]  ;;  %p282_p5 = por %p281_p4, %p280_p3 }
  0x2c   :  { %v65_v24 = vld [vmem:[#allocation5 + $0xc8] sm:$0xff]  ;;  %v39_v25 = vld [vmem:[#allocation2 + $0x8] sm:$0xff]  ;;  %v208_v26 = vpack.c.bf16 %v47_v22, %v46_v21  ;;  %v48_v28 = vld [vmem:[#allocation5 + $0x40] sm:$0xff] }
  0x2d   :  { %136 = vmatprep.mubr.f32.mxu0 %v39_v25  ;;  %v210_v27 = vpack.c.bf16 %v65_v24, %v64_v23  ;;  %v49_v29 = vld [vmem:[#allocation5 + $0x48] sm:$0xff]  ;;  %v66_v30 = vld [vmem:[#allocation5 + $0xd0] sm:$0xff]  ;;  %v67_v31 = vld [vmem:[#allocation5 + $0xd8] sm:$0xff]  ;;  %p283_p6 = pnand %p282_p5, %p276_p2 }
  0x2e   :  { %201 = vmatpush3.bf16.msra.mxu0 %v200_v13  ;;  %v212_v32 = vpack.c.bf16 %v49_v29, %v48_v28  ;;  %v214_v33 = vpack.c.bf16 %v67_v31, %v66_v30  ;;  %v50_v34 = vld [vmem:[#allocation5 + $0x50] sm:$0xff]  ;;  %v51_v35 = vld [vmem:[#allocation5 + $0x58] sm:$0xff]  ;;  %v68_v36 = vld [vmem:[#allocation5 + $0xe0] sm:$0xff] }
  0x2f   :  { %203 = vmatprep.subr.bf16.mxu0 %v202_v14  ;;  %v69_v37 = vld [vmem:[#allocation5 + $0xe8] sm:$0xff]  ;;  %v216_v38 = vpack.c.bf16 %v51_v35, %v50_v34  ;;  %v52_v40 = vld [vmem:[#allocation5 + $0x60] sm:$0xff]  ;;  %v70_v42 = vld [vmem:[#allocation5 + $0xf0] sm:$0xff] }
  0x30   :  { %v218_v39 = vpack.c.bf16 %v69_v37, %v68_v36  ;;  %v53_v41 = vld [vmem:[#allocation5 + $0x68] sm:$0xff]  ;;  %v71_v43 = vld [vmem:[#allocation5 + $0xf8] sm:$0xff]  ;;  %v54_v46 = vld [vmem:[#allocation5 + $0x70] sm:$0xff] }
  0x31   :  { %v220_v44 = vpack.c.bf16 %v53_v41, %v52_v40  ;;  %v222_v45 = vpack.c.bf16 %v71_v43, %v70_v42  ;;  %v55_v47 = vld [vmem:[#allocation5 + $0x78] sm:$0xff]  ;;  %v38_v49 = vld [vmem:[#allocation2] sm:$0xff] }
  0x32   :  { %205 = vmatpush3.bf16.msra.mxu0 %v204_v19  ;;  %v224_v48 = vpack.c.bf16 %v55_v47, %v54_v46 }
  0x33   :  { %207 = vmatprep.subr.bf16.mxu0 %v206_v20 }
  0x36   :  { %209 = vmatpush3.bf16.msra.mxu0 %v208_v26 }
  0x37   :  { %211 = vmatprep.subr.bf16.mxu0 %v210_v27 }
  0x3a   :  { %213 = vmatpush3.bf16.msra.mxu0 %v212_v32 }
  0x3b   :  { %215 = vmatprep.subr.bf16.mxu0 %v214_v33 }
  0x3e   :  { %217 = vmatpush3.bf16.msra.mxu0 %v216_v38 }
  0x3f   :  { %219 = vmatprep.subr.bf16.mxu0 %v218_v39 }
  0x42   :  { %221 = vmatpush3.bf16.msra.mxu0 %v220_v44 }
  0x43   :  { %223 = vmatprep.subr.bf16.mxu0 %v222_v45 }
  0x46   :  { %225 = vmatpush3.bf16.msra.mxu0 %v224_v48 }
  0x49   :  { %137 = vmatmul.mubr.f32.vlgmr.msra.gmra.mrb[0].mxu0 %v38_v49 }
 0x11c   :  { %v191_v50 = vpop.f32.mrb[0].mxu0 }
 0x11d   :  { %v192_v51 = vpop.f32.mrb[1].mxu0 }
 0x11e   :  { %v193_v52 = vadd.f32 %v192_v51, %v191_v50 }
 0x120   :  { %142 = vst [vmem:[#allocation7] sm:$0xff] %v193_v52 }
 0x121   :  { %286 = shalt.err (!%p283_p6)
}
 0x122   :  { %s287_s10 = scalar_lea.hbm %s368_s2, 128 }
 0x123   :  { %p288_p7 = scmp.ne.s32.totalorder %s368_s2, %s287_s10  ;;  %p291_p8 = scmp.lt.u32.totalorder %s287_s10, %s368_s2 }
 0x125   :  { %p293_p9 = pnand %p291_p8, %p288_p7 }
 0x127   :  { %296 = shalt.err (!%p293_p9)
}
 0x128   :  { %152 = dma.vmem_to_hbm [thread:$0]  %s150_s6, 128, %s368_s2, [#allocation4]  }
 0x129   :  { %301 = dma.done.wait [#allocation4], 128  }
 0x12a   :  { %302 = vsyncadd [#allocation4], 4294967168 }
 0x12b   :  { %156 = vsyncpa [#allocation3], 1 }
 0x12c   :  { %157 = vsyncpa [#allocation6], 1 }
 0x12d   :  { %158 = vsyncpa [#allocation4], 1 }

</bundles_post_ra>
